<compile_context>
chip_gen: v5e
topology: v5e:2x2
jax: 0.10.0
libtpu: 0.0.40
codegen_flags: <defaults>
</compile_context>

<pallas_src>
import math

import jax
import jax.numpy as jnp
from jax.experimental import pallas as pl
from jax.experimental.pallas import tpu as pltpu

BN_EPS = 1e-5
HEAD_PAD = 128  # lane-dense padded width of the head output


# ---------------------------------------------------------------------------
# Fused kernel factory (blocks unrolled statically in the traced body)
# ---------------------------------------------------------------------------
def make_fused_dnn_kernel(shortcut_flags):
    """Ref order: x, [per block: w1, b1, w2, b2, (ws, bs if projected shortcut)],
    w_head, b_head, out."""

    def kernel(*refs):
        idx = 0
        x_ref = refs[idx]; idx += 1
        h = x_ref[...]                                   # f32 (tile_b, F)

        for has_shortcut in shortcut_flags:
            w1 = refs[idx]; b1 = refs[idx + 1]
            w2 = refs[idx + 2]; b2 = refs[idx + 3]
            idx += 4
            h_bf = h.astype(jnp.bfloat16)                # single cast reused by both dots
            if has_shortcut:
                ws = refs[idx]; bs = refs[idx + 1]; idx += 2
                ident = jnp.dot(h_bf, ws[...],
                                preferred_element_type=jnp.float32) + bs[...]
            else:
                ident = h                                # identity shortcut: no matmul
            t = jnp.dot(h_bf, w1[...],
                        preferred_element_type=jnp.float32) + b1[...]
            t = jnp.maximum(t, 0.0)                      # ReLU (dropout identity in eval)
            t = jnp.dot(t.astype(jnp.bfloat16), w2[...],
                        preferred_element_type=jnp.float32) + b2[...]
            h = jnp.maximum(t + ident, 0.0)              # residual add + ReLU (f32 VPU)

        w_head = refs[idx]; b_head = refs[idx + 1]; o_ref = refs[idx + 2]
        z = jnp.dot(h.astype(jnp.bfloat16), w_head[...],
                    preferred_element_type=jnp.float32) + b_head[...]
        o_ref[...] = 1.0 / (1.0 + jnp.exp(-z))           # sigmoid, lane-dense store

    return kernel


# ---------------------------------------------------------------------------
# Wrapper: one pallas_call for the whole network, batch-parallel grid
# ---------------------------------------------------------------------------
def _round_up(v, m):
    return ((v + m - 1) // m) * m


def dnn_forward(x, params, *, tile_b=None):
    blocks = params["blocks"]
    w_head, b_head = params["w_head"], params["b_head"]
    B, F_in = x.shape

    # Pick a batch tile (multiple of 8 for sublane alignment, <= 128) and pad
    # the batch so it divides evenly; padded rows are sliced off at the end.
    if tile_b is None:
        tile_b = min(_round_up(B, 8), 128)
    tile_b = _round_up(tile_b, 8)
    B_pad = _round_up(B, tile_b)
    if B_pad != B:
        x = jnp.pad(x, ((0, B_pad - B), (0, 0)))

    def resident_spec(arr):
        shp = arr.shape
        return pl.BlockSpec(shp, lambda i, _n=len(shp): (0,) * _n)

    flat_inputs = [x]
    in_specs = [pl.BlockSpec((tile_b, F_in), lambda i: (i, 0))]
    shortcut_flags = []
    flops = 0
    for blk in blocks:
        has_sc = blk["ws"] is not None
        shortcut_flags.append(has_sc)
        for name in ("w1", "b1", "w2", "b2"):
            flat_inputs.append(blk[name])
            in_specs.append(resident_spec(blk[name]))
        flops += 2 * B_pad * (blk["w1"].shape[0] * blk["w1"].shape[1]
                              + blk["w2"].shape[0] * blk["w2"].shape[1])
        if has_sc:
            flat_inputs += [blk["ws"], blk["bs"]]
            in_specs += [resident_spec(blk["ws"]), resident_spec(blk["bs"])]
            flops += 2 * B_pad * blk["ws"].shape[0] * blk["ws"].shape[1]
    flat_inputs += [w_head, b_head]
    in_specs += [resident_spec(w_head), resident_spec(b_head)]
    flops += 2 * B_pad * w_head.shape[0] * w_head.shape[1]

    bytes_accessed = sum(a.size * a.dtype.itemsize for a in flat_inputs) \
        + B_pad * HEAD_PAD * 4

    kernel = make_fused_dnn_kernel(tuple(shortcut_flags))

    out_padded = pl.pallas_call(
        kernel,
        out_shape=jax.ShapeDtypeStruct((B_pad, HEAD_PAD), jnp.float32),
        grid=(B_pad // tile_b,),
        in_specs=in_specs,
        out_specs=pl.BlockSpec((tile_b, HEAD_PAD), lambda i: (i, 0)),
        compiler_params=pltpu.CompilerParams(
            dimension_semantics=("parallel",),
            vmem_limit_bytes=64 << 20),
        cost_estimate=pl.CostEstimate(flops=flops,
                                      transcendentals=B_pad * HEAD_PAD,
                                      bytes_accessed=bytes_accessed),
    )(*flat_inputs)
    return out_padded[:B, :1]


# ---------------------------------------------------------------------------
# Parameter construction (mirrors DNN._initialize_weights, BN folded in)
# ---------------------------------------------------------------------------
def kaiming_linear(key, in_f, out_f):
    """kaiming_normal_(mode='fan_out', nonlinearity='relu'); returned transposed."""
    std = math.sqrt(2.0 / out_f)
    w = jax.random.normal(key, (out_f, in_f), dtype=jnp.float32) * std
    b = jnp.zeros((out_f,), dtype=jnp.float32)
    return w.T, b                                    # (in_f, out_f), (out_f,)


def fold_bn(w, b):
    """Fold eval-mode BN (default buffers): scale = 1/sqrt(1+eps), shift = 0."""
    scale = 1.0 / math.sqrt(1.0 + BN_EPS)
    return w * scale, b * scale


def make_dnn_params(key, input_size, hidden_sizes):
    blocks = []
    prev = input_size
    for hs in hidden_sizes:
        key, k1, k2, k3 = jax.random.split(key, 4)
        w1, b1 = fold_bn(*kaiming_linear(k1, prev, hs))
        w2, b2 = fold_bn(*kaiming_linear(k2, hs, hs))
        if prev != hs:
            ws, bs = fold_bn(*kaiming_linear(k3, prev, hs))
            ws = ws.astype(jnp.bfloat16)
            bs = bs.reshape(1, hs)
        else:
            ws, bs = None, None                      # identity shortcut (no matmul)
        blocks.append(dict(
            w1=w1.astype(jnp.bfloat16), b1=b1.reshape(1, hs),
            w2=w2.astype(jnp.bfloat16), b2=b2.reshape(1, hs),
            ws=ws, bs=bs))
        prev = hs

    key, kh = jax.random.split(key)
    wh, bh = kaiming_linear(kh, prev, 1)             # head: Linear(prev, 1), no BN
    # Pad head to lane-dense 128 columns; extra columns are zero and sliced off.
    w_head = jnp.zeros((prev, HEAD_PAD), jnp.float32).at[:, :1].set(wh).astype(jnp.bfloat16)
    b_head = jnp.zeros((1, HEAD_PAD), jnp.float32).at[0, :1].set(bh)
    return dict(blocks=blocks, w_head=w_head, b_head=b_head)


# ---------------------------------------------------------------------------
# Pure-JAX reference with matching bf16 matmul-input rounding
# ---------------------------------------------------------------------------
def dnn_forward_ref(x, params):
    def mm(h, w_bf16, b):
        return jnp.dot(h.astype(jnp.bfloat16).astype(jnp.float32),
                       w_bf16.astype(jnp.float32)) + b

    h = x
    for blk in params["blocks"]:
        ident = mm(h, blk["ws"], blk["bs"]) if blk["ws"] is not None else h
        t = jnp.maximum(mm(h, blk["w1"], blk["b1"]), 0.0)
        t = mm(t, blk["w2"], blk["b2"])
        h = jnp.maximum(t + ident, 0.0)
    z = mm(h, params["w_head"], params["b_head"])
    return jax.nn.sigmoid(z)[:, :1]


# ---------------------------------------------------------------------------
if __name__ == "__main__":
    key = jax.random.PRNGKey(0)
    B, input_size = 8, 16
    hidden_sizes = [32, 32]                          # block 1 projected, block 2 identity

    kx, kp = jax.random.split(key)
    x = jax.random.normal(kx, (B, input_size), dtype=jnp.float32)
    params = make_dnn_params(kp, input_size, hidden_sizes)

    out = dnn_forward(x, params)
    out = jax.block_until_ready(out)

    ref = dnn_forward_ref(x, params)
    assert out.shape == (B, 1), out.shape
    max_err = float(jnp.max(jnp.abs(out - ref)))
    assert max_err < 1e-4, f"max err {max_err}"

    print("KERNEL_OK")
</pallas_src>

<mosaic_0001>
module attributes {stable_mosaic.version = 11 : i64} {
  func.func @kernel(%arg0: i32, %arg1: memref<8x16xf32, #tpu.memory_space<vmem>>, %arg2: memref<16x32xbf16, #tpu.memory_space<vmem>>, %arg3: memref<1x32xf32, #tpu.memory_space<vmem>>, %arg4: memref<32x32xbf16, #tpu.memory_space<vmem>>, %arg5: memref<1x32xf32, #tpu.memory_space<vmem>>, %arg6: memref<16x32xbf16, #tpu.memory_space<vmem>>, %arg7: memref<1x32xf32, #tpu.memory_space<vmem>>, %arg8: memref<32x32xbf16, #tpu.memory_space<vmem>>, %arg9: memref<1x32xf32, #tpu.memory_space<vmem>>, %arg10: memref<32x32xbf16, #tpu.memory_space<vmem>>, %arg11: memref<1x32xf32, #tpu.memory_space<vmem>>, %arg12: memref<32x128xbf16, #tpu.memory_space<vmem>>, %arg13: memref<1x128xf32, #tpu.memory_space<vmem>>, %arg14: memref<8x128xf32, #tpu.memory_space<vmem>>) attributes {dimension_semantics = [#tpu.dimension_semantics<parallel>], iteration_bounds = array<i64: 1>, scalar_prefetch = 0 : i64, scratch_operands = 0 : i64, tpu.core_type = #tpu.core_type<tc>, window_params = [{transform_indices = @transform_0, window_bounds = array<i64: 8, 16>}, {pipeline_mode = #tpu.pipeline_mode<synchronous>, transform_indices = @transform_1, window_bounds = array<i64: 16, 32>}, {pipeline_mode = #tpu.pipeline_mode<synchronous>, transform_indices = @transform_2, window_bounds = array<i64: 1, 32>}, {pipeline_mode = #tpu.pipeline_mode<synchronous>, transform_indices = @transform_3, window_bounds = array<i64: 32, 32>}, {pipeline_mode = #tpu.pipeline_mode<synchronous>, transform_indices = @transform_4, window_bounds = array<i64: 1, 32>}, {pipeline_mode = #tpu.pipeline_mode<synchronous>, transform_indices = @transform_5, window_bounds = array<i64: 16, 32>}, {pipeline_mode = #tpu.pipeline_mode<synchronous>, transform_indices = @transform_6, window_bounds = array<i64: 1, 32>}, {pipeline_mode = #tpu.pipeline_mode<synchronous>, transform_indices = @transform_7, window_bounds = array<i64: 32, 32>}, {pipeline_mode = #tpu.pipeline_mode<synchronous>, transform_indices = @transform_8, window_bounds = array<i64: 1, 32>}, {pipeline_mode = #tpu.pipeline_mode<synchronous>, transform_indices = @transform_9, window_bounds = array<i64: 32, 32>}, {pipeline_mode = #tpu.pipeline_mode<synchronous>, transform_indices = @transform_10, window_bounds = array<i64: 1, 32>}, {pipeline_mode = #tpu.pipeline_mode<synchronous>, transform_indices = @transform_11, window_bounds = array<i64: 32, 128>}, {pipeline_mode = #tpu.pipeline_mode<synchronous>, transform_indices = @transform_12, window_bounds = array<i64: 1, 128>}, {transform_indices = @transform_13, window_bounds = array<i64: 8, 128>}]} {
    %c0 = arith.constant 0 : index
    %c0_0 = arith.constant 0 : index
    %0 = vector.load %arg1[%c0, %c0_0] : memref<8x16xf32, #tpu.memory_space<vmem>>, vector<8x16xf32>
    %1 = arith.truncf %0 : vector<8x16xf32> to vector<8x16xbf16>
    %c0_1 = arith.constant 0 : index
    %c0_2 = arith.constant 0 : index
    %2 = vector.load %arg6[%c0_1, %c0_2] : memref<16x32xbf16, #tpu.memory_space<vmem>>, vector<16x32xbf16>
    %cst = arith.constant dense<0.000000e+00> : vector<8x32xf32>
    %3 = tpu.matmul %1, %2, %cst {dimension_numbers = #tpu.dot_dimension_numbers<[1], [0], [0], [1], [0, 0, 1, 1], [], []>} : vector<8x16xbf16>, vector<16x32xbf16>, vector<8x32xf32> -> vector<8x32xf32>
    %c0_3 = arith.constant 0 : index
    %c0_4 = arith.constant 0 : index
    %4 = vector.load %arg7[%c0_3, %c0_4] : memref<1x32xf32, #tpu.memory_space<vmem>>, vector<1x32xf32>
    %5 = vector.broadcast %4 : vector<1x32xf32> to vector<8x32xf32>
    %6 = arith.addf %3, %5 : vector<8x32xf32>
    %c0_5 = arith.constant 0 : index
    %c0_6 = arith.constant 0 : index
    %7 = vector.load %arg2[%c0_5, %c0_6] : memref<16x32xbf16, #tpu.memory_space<vmem>>, vector<16x32xbf16>
    %cst_7 = arith.constant dense<0.000000e+00> : vector<8x32xf32>
    %8 = tpu.matmul %1, %7, %cst_7 {dimension_numbers = #tpu.dot_dimension_numbers<[1], [0], [0], [1], [0, 0, 1, 1], [], []>} : vector<8x16xbf16>, vector<16x32xbf16>, vector<8x32xf32> -> vector<8x32xf32>
    %c0_8 = arith.constant 0 : index
    %c0_9 = arith.constant 0 : index
    %9 = vector.load %arg3[%c0_8, %c0_9] : memref<1x32xf32, #tpu.memory_space<vmem>>, vector<1x32xf32>
    %10 = vector.broadcast %9 : vector<1x32xf32> to vector<8x32xf32>
    %11 = arith.addf %8, %10 : vector<8x32xf32>
    %cst_10 = arith.constant 0.000000e+00 : f32
    %12 = vector.broadcast %cst_10 : f32 to vector<8x32xf32>
    %13 = arith.maximumf %11, %12 : vector<8x32xf32>
    %14 = arith.truncf %13 : vector<8x32xf32> to vector<8x32xbf16>
    %c0_11 = arith.constant 0 : index
    %c0_12 = arith.constant 0 : index
    %15 = vector.load %arg4[%c0_11, %c0_12] : memref<32x32xbf16, #tpu.memory_space<vmem>>, vector<32x32xbf16>
    %cst_13 = arith.constant dense<0.000000e+00> : vector<8x32xf32>
    %16 = tpu.matmul %14, %15, %cst_13 {dimension_numbers = #tpu.dot_dimension_numbers<[1], [0], [0], [1], [0, 0, 1, 1], [], []>} : vector<8x32xbf16>, vector<32x32xbf16>, vector<8x32xf32> -> vector<8x32xf32>
    %c0_14 = arith.constant 0 : index
    %c0_15 = arith.constant 0 : index
    %17 = vector.load %arg5[%c0_14, %c0_15] : memref<1x32xf32, #tpu.memory_space<vmem>>, vector<1x32xf32>
    %18 = vector.broadcast %17 : vector<1x32xf32> to vector<8x32xf32>
    %19 = arith.addf %16, %18 : vector<8x32xf32>
    %20 = arith.addf %19, %6 : vector<8x32xf32>
    %cst_16 = arith.constant 0.000000e+00 : f32
    %21 = vector.broadcast %cst_16 : f32 to vector<8x32xf32>
    %22 = arith.maximumf %20, %21 : vector<8x32xf32>
    %23 = arith.truncf %22 : vector<8x32xf32> to vector<8x32xbf16>
    %c0_17 = arith.constant 0 : index
    %c0_18 = arith.constant 0 : index
    %24 = vector.load %arg8[%c0_17, %c0_18] : memref<32x32xbf16, #tpu.memory_space<vmem>>, vector<32x32xbf16>
    %cst_19 = arith.constant dense<0.000000e+00> : vector<8x32xf32>
    %25 = tpu.matmul %23, %24, %cst_19 {dimension_numbers = #tpu.dot_dimension_numbers<[1], [0], [0], [1], [0, 0, 1, 1], [], []>} : vector<8x32xbf16>, vector<32x32xbf16>, vector<8x32xf32> -> vector<8x32xf32>
    %c0_20 = arith.constant 0 : index
    %c0_21 = arith.constant 0 : index
    %26 = vector.load %arg9[%c0_20, %c0_21] : memref<1x32xf32, #tpu.memory_space<vmem>>, vector<1x32xf32>
    %27 = vector.broadcast %26 : vector<1x32xf32> to vector<8x32xf32>
    %28 = arith.addf %25, %27 : vector<8x32xf32>
    %cst_22 = arith.constant 0.000000e+00 : f32
    %29 = vector.broadcast %cst_22 : f32 to vector<8x32xf32>
    %30 = arith.maximumf %28, %29 : vector<8x32xf32>
    %31 = arith.truncf %30 : vector<8x32xf32> to vector<8x32xbf16>
    %c0_23 = arith.constant 0 : index
    %c0_24 = arith.constant 0 : index
    %32 = vector.load %arg10[%c0_23, %c0_24] : memref<32x32xbf16, #tpu.memory_space<vmem>>, vector<32x32xbf16>
    %cst_25 = arith.constant dense<0.000000e+00> : vector<8x32xf32>
    %33 = tpu.matmul %31, %32, %cst_25 {dimension_numbers = #tpu.dot_dimension_numbers<[1], [0], [0], [1], [0, 0, 1, 1], [], []>} : vector<8x32xbf16>, vector<32x32xbf16>, vector<8x32xf32> -> vector<8x32xf32>
    %c0_26 = arith.constant 0 : index
    %c0_27 = arith.constant 0 : index
    %34 = vector.load %arg11[%c0_26, %c0_27] : memref<1x32xf32, #tpu.memory_space<vmem>>, vector<1x32xf32>
    %35 = vector.broadcast %34 : vector<1x32xf32> to vector<8x32xf32>
    %36 = arith.addf %33, %35 : vector<8x32xf32>
    %37 = arith.addf %36, %22 : vector<8x32xf32>
    %cst_28 = arith.constant 0.000000e+00 : f32
    %38 = vector.broadcast %cst_28 : f32 to vector<8x32xf32>
    %39 = arith.maximumf %37, %38 : vector<8x32xf32>
    %40 = arith.truncf %39 : vector<8x32xf32> to vector<8x32xbf16>
    %c0_29 = arith.constant 0 : index
    %c0_30 = arith.constant 0 : index
    %41 = vector.load %arg12[%c0_29, %c0_30] : memref<32x128xbf16, #tpu.memory_space<vmem>>, vector<32x128xbf16>
    %cst_31 = arith.constant dense<0.000000e+00> : vector<8x128xf32>
    %42 = tpu.matmul %40, %41, %cst_31 {dimension_numbers = #tpu.dot_dimension_numbers<[1], [0], [0], [1], [0, 0, 1, 1], [], []>} : vector<8x32xbf16>, vector<32x128xbf16>, vector<8x128xf32> -> vector<8x128xf32>
    %c0_32 = arith.constant 0 : index
    %c0_33 = arith.constant 0 : index
    %43 = vector.load %arg13[%c0_32, %c0_33] : memref<1x128xf32, #tpu.memory_space<vmem>>, vector<1x128xf32>
    %44 = vector.broadcast %43 : vector<1x128xf32> to vector<8x128xf32>
    %45 = arith.addf %42, %44 : vector<8x128xf32>
    %cst_34 = arith.constant 0.000000e+00 : f32
    %46 = vector.broadcast %cst_34 : f32 to vector<8x128xf32>
    %47 = arith.subf %46, %45 : vector<8x128xf32>
    %48 = math.exp %47 : vector<8x128xf32>
    %cst_35 = arith.constant 1.000000e+00 : f32
    %49 = vector.broadcast %cst_35 : f32 to vector<8x128xf32>
    %50 = arith.addf %49, %48 : vector<8x128xf32>
    %cst_36 = arith.constant 1.000000e+00 : f32
    %51 = vector.broadcast %cst_36 : f32 to vector<8x128xf32>
    %52 = arith.divf %51, %50 : vector<8x128xf32>
    %c0_37 = arith.constant 0 : index
    %c0_38 = arith.constant 0 : index
    %53 = vector.load %arg14[%c0_37, %c0_38] : memref<8x128xf32, #tpu.memory_space<vmem>>, vector<8x128xf32>
    tpu.vector_store %arg14[%c0_37, %c0_38], %52 {strides = array<i32>} : memref<8x128xf32, #tpu.memory_space<vmem>>, vector<8x128xf32>,
    return
  }
  func.func @transform_0(%arg0: i32) -> (i32, i32) {
    %c0_i32 = arith.constant 0 : i32
    %c0_i32_0 = arith.constant 0 : i32
    return %arg0, %c0_i32 : i32, i32
  }
  func.func @transform_1(%arg0: i32) -> (i32, i32) {
    %c0_i32 = arith.constant 0 : i32
    %c0_i32_0 = arith.constant 0 : i32
    %c0_i32_1 = arith.constant 0 : i32
    return %c0_i32, %c0_i32_0 : i32, i32
  }
  func.func @transform_2(%arg0: i32) -> (i32, i32) {
    %c0_i32 = arith.constant 0 : i32
    %c0_i32_0 = arith.constant 0 : i32
    %c0_i32_1 = arith.constant 0 : i32
    return %c0_i32, %c0_i32_0 : i32, i32
  }
  func.func @transform_3(%arg0: i32) -> (i32, i32) {
    %c0_i32 = arith.constant 0 : i32
    %c0_i32_0 = arith.constant 0 : i32
    %c0_i32_1 = arith.constant 0 : i32
    return %c0_i32, %c0_i32_0 : i32, i32
  }
  func.func @transform_4(%arg0: i32) -> (i32, i32) {
    %c0_i32 = arith.constant 0 : i32
    %c0_i32_0 = arith.constant 0 : i32
    %c0_i32_1 = arith.constant 0 : i32
    return %c0_i32, %c0_i32_0 : i32, i32
  }
  func.func @transform_5(%arg0: i32) -> (i32, i32) {
    %c0_i32 = arith.constant 0 : i32
    %c0_i32_0 = arith.constant 0 : i32
    %c0_i32_1 = arith.constant 0 : i32
    return %c0_i32, %c0_i32_0 : i32, i32
  }
  func.func @transform_6(%arg0: i32) -> (i32, i32) {
    %c0_i32 = arith.constant 0 : i32
    %c0_i32_0 = arith.constant 0 : i32
    %c0_i32_1 = arith.constant 0 : i32
    return %c0_i32, %c0_i32_0 : i32, i32
  }
  func.func @transform_7(%arg0: i32) -> (i32, i32) {
    %c0_i32 = arith.constant 0 : i32
    %c0_i32_0 = arith.constant 0 : i32
    %c0_i32_1 = arith.constant 0 : i32
    return %c0_i32, %c0_i32_0 : i32, i32
  }
  func.func @transform_8(%arg0: i32) -> (i32, i32) {
    %c0_i32 = arith.constant 0 : i32
    %c0_i32_0 = arith.constant 0 : i32
    %c0_i32_1 = arith.constant 0 : i32
    return %c0_i32, %c0_i32_0 : i32, i32
  }
  func.func @transform_9(%arg0: i32) -> (i32, i32) {
    %c0_i32 = arith.constant 0 : i32
    %c0_i32_0 = arith.constant 0 : i32
    %c0_i32_1 = arith.constant 0 : i32
    return %c0_i32, %c0_i32_0 : i32, i32
  }
  func.func @transform_10(%arg0: i32) -> (i32, i32) {
    %c0_i32 = arith.constant 0 : i32
    %c0_i32_0 = arith.constant 0 : i32
    %c0_i32_1 = arith.constant 0 : i32
    return %c0_i32, %c0_i32_0 : i32, i32
  }
  func.func @transform_11(%arg0: i32) -> (i32, i32) {
    %c0_i32 = arith.constant 0 : i32
    %c0_i32_0 = arith.constant 0 : i32
    %c0_i32_1 = arith.constant 0 : i32
    return %c0_i32, %c0_i32_0 : i32, i32
  }
  func.func @transform_12(%arg0: i32) -> (i32, i32) {
    %c0_i32 = arith.constant 0 : i32
    %c0_i32_0 = arith.constant 0 : i32
    %c0_i32_1 = arith.constant 0 : i32
    return %c0_i32, %c0_i32_0 : i32, i32
  }
  func.func @transform_13(%arg0: i32) -> (i32, i32) {
    %c0_i32 = arith.constant 0 : i32
    %c0_i32_0 = arith.constant 0 : i32
    return %arg0, %c0_i32 : i32, i32
  }
}

</mosaic_0001>

<bundles_post_ra>
// kernel: tpu_custom_call.1
= control target key start
LH: loop header
LB: loop body
LE: loop exit
PB: predicated region body
PF: predicated region fallthrough
CT: control target
= control target key end

     0   :  { %18 = vsyncpa [#allocation3], 0  ;;  %s826_s0 = inlined_call_operand.hbm [shape: f32[8,16], index: 0, kind: input, shape index: {}]   ;;  %s827_s1 = inlined_call_operand.hbm [shape: bf16[16,32], index: 1, kind: input, shape index: {}]   ;;  %s828_s2 = inlined_call_operand.vmem [shape: f32[1,32], index: 2, kind: input, shape index: {}]   ;;  %s829_s3 = inlined_call_operand.hbm [shape: bf16[32,32], index: 3, kind: input, shape index: {}]   ;;  %s830_s4 = inlined_call_operand.vmem [shape: f32[1,32], index: 4, kind: input, shape index: {}]   ;;  %s831_s5 = inlined_call_operand.hbm [shape: bf16[16,32], index: 5, kind: input, shape index: {}]   ;;  %s832_s6 = inlined_call_operand.vmem [shape: f32[1,32], index: 6, kind: input, shape index: {}]   ;;  %s833_s7 = inlined_call_operand.hbm [shape: bf16[32,32], index: 7, kind: input, shape index: {}]   ;;  %s834_s8 = inlined_call_operand.vmem [shape: f32[1,32], index: 8, kind: input, shape index: {}]   ;;  %s835_s9 = inlined_call_operand.hbm [shape: bf16[32,32], index: 9, kind: input, shape index: {}]   ;;  %s836_s10 = inlined_call_operand.vmem [shape: f32[1,32], index: 10, kind: input, shape index: {}]   ;;  %s837_s11 = inlined_call_operand.hbm [shape: bf16[32,128], index: 11, kind: input, shape index: {}]   ;;  %s838_s12 = inlined_call_operand.vmem [shape: f32[1,128], index: 12, kind: input, shape index: {}]   ;;  %s839_s13 = inlined_call_operand.hbm [shape: f32[8,128], index: 13, kind: output, shape index: {}]  }
   0x1   :  { %19 = vsyncpa [#allocation6], 0 }
   0x2   :  { %20 = vsyncpa [#allocation9], 0 }
   0x3   :  { %21 = vsyncpa [#allocation12], 0  ;;  %s38_s27 = sshll.u32 %s827_s1, 4  ;;  %s39_s27 = int_to_ptr.hbm [resolvable:$true] %s38_s27 }
   0x4   :  { %22 = vsyncpa [#allocation4], 0  ;;  %s682_s28 = smov [#allocation5]   ;;  %s68_s15 = sshll.u32 %s831_s5, 4  ;;  %s69_s15 = int_to_ptr.hbm [resolvable:$true] %s68_s15 }
   0x5   :  { %s40_s29 = sshll.u32 %s682_s28, 4  ;;  %s683_s16 = smov 64   ;;  %s41_s29 = int_to_ptr.vmem [resolvable:$true] %s40_s29 }
   0x6   :  { %s684_s17 = smov 4   ;;  %s685_s18 = smov [#allocation8]  }
   0x7   :  { %46 = dma.hbm_to_vmem [thread:$0]  %s39_s27, 128, %s41_s29, [#allocation6], %s683_s16, %s683_s16, %s684_s17  }
   0x8   :  { %s70_s19 = sshll.u32 %s685_s18, 4  ;;  %s98_s21 = sshll.u32 %s835_s9, 4  ;;  %s71_s19 = int_to_ptr.vmem [resolvable:$true] %s70_s19  ;;  %s99_s21 = int_to_ptr.hbm [resolvable:$true] %s98_s21 }
   0x9   :  { %76 = dma.hbm_to_vmem [thread:$0]  %s69_s15, 128, %s71_s19, [#allocation9], %s683_s16, %s683_s16, %s684_s17  }
   0xa   :  { %s28_s23 = sshll.u32 %s826_s0, 4  ;;  %s686_s24 = smov [#allocation11]   ;;  %s29_s23 = int_to_ptr.hbm [resolvable:$true] %s28_s23 }
   0xb   :  { %s100_s25 = sshll.u32 %s686_s24, 4  ;;  %s687_s26 = smov [#allocation2]   ;;  %s101_s25 = int_to_ptr.vmem [resolvable:$true] %s100_s25 }
   0xc   :  { %106 = dma.hbm_to_vmem [thread:$0]  %s99_s21, 256, %s101_s25, [#allocation12], %s683_s16, %s683_s16, %s684_s17  }
   0xd   :  { %s30_s9 = sshll.u32 %s687_s26, 4  ;;  %s53_s29 = sshll.u32 %s829_s3, 4  ;;  %s31_s9 = int_to_ptr.vmem [resolvable:$true] %s30_s9  ;;  %s54_s29 = int_to_ptr.hbm [resolvable:$true] %s53_s29 }
   0xe   :  { %33 = dma.hbm_to_vmem [thread:$0]  %s29_s23, 128, %s31_s9, [#allocation3]  }
   0xf   :  { %s83_s0 = sshll.u32 %s833_s7, 4  ;;  %s688_s15 = smov [#allocation7]   ;;  %s84_s0 = int_to_ptr.hbm [resolvable:$true] %s83_s0 }
  0x10   :  { %s55_s18 = sshll.u32 %s688_s15, 4  ;;  %s689_s19 = smov [#allocation10]   ;;  %s56_s18 = int_to_ptr.vmem [resolvable:$true] %s55_s18 }
  0x11   :  { %61 = dma.hbm_to_vmem [thread:$0]  %s54_s29, 256, %s56_s18, [#allocation6], %s683_s16, %s683_s16, %s684_s17  }
  0x12   :  { %s85_s20 = sshll.u32 %s689_s19, 4  ;;  %s113_s3 = sshll.u32 %s837_s11, 4  ;;  %s86_s20 = int_to_ptr.vmem [resolvable:$true] %s85_s20  ;;  %s114_s3 = int_to_ptr.hbm [resolvable:$true] %s113_s3 }
  0x13   :  { %91 = dma.hbm_to_vmem [thread:$0]  %s84_s0, 256, %s86_s20, [#allocation9], %s683_s16, %s683_s16, %s684_s17  }
  0x14   :  { %s690_s7 = smov [#allocation13]  }
  0x15   :  { %s115_s5 = sshll.u32 %s690_s7, 4  ;;  %s116_s5 = int_to_ptr.vmem [resolvable:$true] %s115_s5 }
  0x16   :  { %121 = dma.hbm_to_vmem [thread:$0]  %s114_s3, 256, %s116_s5, [#allocation12], %s683_s16, %s683_s16, %s684_s17  }
  0x17   :  { %672 = dma.done.wait [#allocation3], 128  }
  0x18   :  { %673 = vsyncadd [#allocation3], 4294967168 }
  0x19   :  { %674 = dma.done.wait [#allocation6], 384  }
  0x1a   :  { %675 = vsyncadd [#allocation6], 4294966912 }
  0x1b   :  { %676 = dma.done.wait [#allocation9], 384  }
  0x1c   :  { %677 = vsyncadd [#allocation9], 4294966912 }
  0x1d   :  { %678 = dma.done.wait [#allocation12], 512  }
  0x1e   :  { %679 = vsyncadd [#allocation12], 4294966784  ;;  %v451_v0 = vld [vmem:[#allocation5] sm:$0xff]  ;;  %v153_v1 = vld [vmem:[#allocation2] sm:$0xff]  ;;  %vm167_vm0 = vcmask 130048   ;;  %vm231_vm1 = vcmask 261120  }
  0x1f   :  { %v154_v2 = vpack.c.bf16 %v153_v1, %v153_v1  ;;  %203 = vmatpush.bf16.msra.mxu1 %v451_v0  ;;  %v453_v3 = vld [vmem:[#allocation7 + $0x8] sm:$0xff]  ;;  %v450_v4 = vld [vmem:[#allocation8] sm:$0xff]  ;;  %v452_v5 = vld [vmem:[#allocation7] sm:$0xff]  ;;  %s391_s28 = sshll.u32 %s839_s13, 4  ;;  %s392_s28 = int_to_ptr.hbm [resolvable:$true] %s391_s28 }
  0x20   :  { %241 = vmatpush.bf16.msra.mxu2 %v453_v3  ;;  %178 = vmatpush.bf16.msra.mxu0 %v450_v4  ;;  %v470_v6 = vld [vmem:[%s828_s2] ss:$0 sm:$0xff]  ;;  %v455_v14 = vld [vmem:[#allocation10 + $0x8] sm:$0xff]  ;;  %v454_v15 = vld [vmem:[#allocation10] sm:$0xff] }
  0x21   :  { %280 = vmatpush.bf16.msra.mxu3 %v455_v14  ;;  %v457_v16 = vld [vmem:[#allocation11 + $0x8] sm:$0xff]  ;;  %v456_v17 = vld [vmem:[#allocation11] sm:$0xff]  ;;  %v459_v27 = vld [vmem:[#allocation13 + $0x8] sm:$0xff] }
  0x22   :  { %413 = vmatmul.msk.bf16.vlgmr.msra.gmra.mxu1 %vm167_vm0, %v154_v2  ;;  %v471_v18 = vld [vmem:[%s832_s6] ss:$0 sm:$0xff]  ;;  %v458_v34 = vld [vmem:[#allocation13] sm:$0xff] }
  0x23   :  { %408 = vmatmul.msk.bf16.vlgmr.msra.gmra.mxu0 %vm167_vm0, %v154_v2  ;;  %v472_v19 = vld [vmem:[%s830_s4] ss:$0 sm:$0xff]  ;;  %357 = vmatpush.bf16.msrb.mxu1 %v459_v27 }
  0x24   :  { %242 = vmatpush.bf16.msra.mxu2 %v452_v5  ;;  %318 = vmatpush.bf16.msrb.mxu0 %v457_v16  ;;  %v473_v28 = vld [vmem:[%s834_s8] ss:$0 sm:$0xff] }
  0x25   :  { %281 = vmatpush.bf16.msra.mxu3 %v454_v15  ;;  %v474_v35 = vld [vmem:[%s836_s10] ss:$0 sm:$0xff]  ;;  %s691_s10 = smov [#allocation14]  }
  0x26   :  { %v475_v42 = vld [vmem:[%s838_s12] ss:$0 sm:$0xff]  ;;  %s389_s9 = sshll.u32 %s691_s10, 4  ;;  %s390_s9 = int_to_ptr.vmem [resolvable:$true] %s389_s9 }
  0x27   :  { %358 = vmatpush.bf16.msrb.mxu1 %v458_v34 }
  0x28   :  { %319 = vmatpush.bf16.msrb.mxu0 %v456_v17 }
  0x9f   :  { %v205_v7 = vpop.f32.mrf.mxu1 }
  0xa0   :  { %v206_v8 = vadd.f32 %v470_v6, %v205_v7  ;;  %v180_v12 = vpop.f32.mrf.mxu0 }
  0xa1   :  { %v181_v20 = vadd.f32 %v471_v18, %v180_v12 }
  0xa2   :  { %v209_v9 = vmax.f32 %v206_v8, 0.0 }
  0xa4   :  { %v210_v10 = vpack.c.bf16 %v209_v9, %v209_v9 }
  0xa6   :  { %422 = vmatmul.msk.bf16.vlgmr.msra.gmra.mxu2 %vm231_vm1, %v210_v10 }
  0xa7   :  { %v207_v11 = vpop.f32.mrf.mxu1 }
  0xa8   :  { %v182_v13 = vpop.f32.mrf.mxu0 }
 0x129   :  { %v244_v21 = vpop.f32.mrf.mxu2 }
 0x12a   :  { %v245_v22 = vadd.f32 %v472_v19, %v244_v21 }
 0x12c   :  { %v248_v23 = vadd.f32 %v245_v22, %v181_v20 }
 0x12e   :  { %v249_v24 = vmax.f32 %v248_v23, 0.0 }
 0x130   :  { %v250_v25 = vpack.c.bf16 %v249_v24, %v249_v24 }
 0x131   :  { %v246_v26 = vpop.f32.mrf.mxu2 }
 0x132   :  { %431 = vmatmul.msk.bf16.vlgmr.msra.gmra.mxu3 %vm231_vm1, %v250_v25 }
 0x1b5   :  { %v283_v29 = vpop.f32.mrf.mxu3 }
 0x1b6   :  { %v284_v30 = vadd.f32 %v473_v28, %v283_v29 }
 0x1b8   :  { %v287_v31 = vmax.f32 %v284_v30, 0.0 }
 0x1ba   :  { %v288_v32 = vpack.c.bf16 %v287_v31, %v287_v31 }
 0x1bc   :  { %440 = vmatmul.msk.bf16.vlgmr.msrb.gmra.mxu0 %vm231_vm1, %v288_v32 }
 0x1bd   :  { %v285_v33 = vpop.f32.mrf.mxu3 }
 0x239   :  { %v321_v36 = vpop.f32.mrf.mxu0 }
 0x23a   :  { %v322_v37 = vadd.f32 %v474_v35, %v321_v36 }
 0x23c   :  { %v325_v38 = vadd.f32 %v322_v37, %v249_v24 }
 0x23e   :  { %v326_v39 = vmax.f32 %v325_v38, 0.0 }
 0x240   :  { %v327_v40 = vpack.c.bf16 %v326_v39, %v326_v39 }
 0x241   :  { %v323_v41 = vpop.f32.mrf.mxu0 }
 0x242   :  { %449 = vmatmul.msk.bf16.vlgmr.msrb.gmra.mxu1 %vm231_vm1, %v327_v40 }
 0x2bf   :  { %v360_v43 = vpop.f32.mrf.mxu1 }
 0x2c0   :  { %v361_v44 = vadd.f32 %v475_v42, %v360_v43 }
 0x2c2   :  { %v364_v45 = vsub.f32 0.0, %v361_v44 }
 0x2c4   :  { %v365_v46 = vmul.f32 1.442695, %v364_v45 }
 0x2c6   :  { %476 = vpow2.f32 %v365_v46 }
 0x2c7   :  { %v362_v47 = vpop.f32.mrf.mxu1 }
 0x2cc   :  { %v477_v48 = vpop.eup %476 }
 0x2cd   :  { %v367_v49 = vadd.f32 1.0, %v477_v48 }
 0x2cf   :  { %478 = vrcp.f32 %v367_v49  ;;  %v379_v53 = vand.u32 2147483648, %v367_v49  ;;  %v377_v55 = vand.u32 2147483647, %v367_v49  ;;  %vm373_vm3 = vweird.f32 %v367_v49 }
 0x2d1   :  { %v380_v57 = vor.u32 1.1754944e-38, %v379_v53  ;;  %vm378_vm5 = vcmp.eq.f32.partialorder %v377_v55, 8.507059e+37 }
 0x2d5   :  { %v479_v50 = vpop.eup %478 }
 0x2d6   :  { %v369_v51 = vmul.f32 %v479_v50, %v367_v49  ;;  %vm374_vm2 = vweird.f32 %v479_v50 }
 0x2d7   :  { %vm375_vm4 = vmor %vm373_vm3, %vm374_vm2 }
 0x2d8   :  { %v370_v52 = vsub.f32 1.0, %v369_v51 }
 0x2da   :  { %v371_v54 = vmul.f32 %v479_v50, %v370_v52 }
 0x2dc   :  { %v372_v56 = vadd.f32 %v479_v50, %v371_v54 }
 0x2de   :  { %v376_v58 = vsel %vm375_vm4, %v479_v50, %v372_v56 }
 0x2df   :  { %v381_v59 = vsel %vm378_vm5, %v380_v57, %v376_v58 }
 0x2e0   :  { %383 = vst [vmem:[#allocation14] sm:$0xff] %v381_v59 }
 0x2e1   :  { %394 = dma.vmem_to_hbm [thread:$0]  %s390_s9, 128, %s392_s28, [#allocation4]  }
 0x2e2   :  { %680 = dma.done.wait [#allocation4], 128  }
 0x2e3   :  { %681 = vsyncadd [#allocation4], 4294967168 }
 0x2e4   :  { %399 = vsyncpa [#allocation3], 1 }
 0x2e5   :  { %400 = vsyncpa [#allocation6], 1 }
 0x2e6   :  { %401 = vsyncpa [#allocation9], 1 }
 0x2e7   :  { %402 = vsyncpa [#allocation12], 1 }
 0x2e8   :  { %403 = vsyncpa [#allocation4], 1 }

</bundles_post_ra>
